<compile_context>
chip_gen: v5e
topology: v5e:2x2
jax: 0.10.0
libtpu: 0.0.40
codegen_flags: <defaults>
</compile_context>

<pallas_src>
import itertools

import jax
import jax.numpy as jnp
from jax.experimental import pallas as pl
from jax.experimental.pallas import tpu as pltpu


def _round_up(x, m):
    return -(-x // m) * m


# ---------------------------------------------------------------------------
# Pallas kernel: whole-batch two-layer GCN (the matmul hot path).
# Inputs are already flattened / normalized / padded:
#   x_ref : (BN, F_in)          node features, batch folded onto rows
#   a_ref : (BN, BN)            block-diagonal normalized adjacency A_hat
#   p_ref : (rows, lanes)       packed [W1 | b1 | W2 | b2] slab, 128-lane padded
#   o_ref : (BN, F_pad)         lane-dense output slab
# ---------------------------------------------------------------------------
def _make_gcn_kernel(f_in, h_pad, f_pad, r_w1, r_b1, r_w2, r_b2):
    def kernel(x_ref, a_ref, p_ref, o_ref):
        a_hat = a_ref[...]                              # reused by both layers
        x = x_ref[...]

        # Static slices into the packed parameter slab (row offsets are
        # multiples of 8, lane extents multiples of 128).
        w1 = p_ref[r_w1:r_w1 + f_in, 0:h_pad]           # (F_in, H_pad)
        b1 = p_ref[r_b1:r_b1 + 1, 0:h_pad]              # (1,    H_pad)
        w2 = p_ref[r_w2:r_w2 + h_pad, 0:f_pad]          # (H_pad, F_pad)
        b2 = p_ref[r_b2:r_b2 + 1, 0:f_pad]              # (1,    F_pad)

        # layer 1 (aggregate-then-transform): sigmoid((A X) W1 + b1)
        ax = jnp.dot(a_hat, x, preferred_element_type=jnp.float32)
        h = jax.nn.sigmoid(
            jnp.dot(ax, w1, preferred_element_type=jnp.float32) + b1)

        # layer 2: sigmoid((A h) W2 + b2); W2 rows >= hidden are zero, so the
        # sigmoid(0)=0.5 values in h's padded lanes contribute nothing.
        ah = jnp.dot(a_hat, h, preferred_element_type=jnp.float32)
        o_ref[...] = jax.nn.sigmoid(
            jnp.dot(ah, w2, preferred_element_type=jnp.float32) + b2)

    return kernel


def two_layer_gcn(x_flat, a_blk, params_packed, f_in, hidden, f_out):
    """x_flat: (BN, F_in), a_blk: (BN, BN), params_packed: (rows, lanes)."""
    bn = x_flat.shape[0]
    h_pad = _round_up(hidden, 128)
    f_pad = _round_up(f_out, 128)
    f_in_r = _round_up(f_in, 8)
    r_w1, r_b1, r_w2, r_b2 = 0, f_in_r, f_in_r + 8, f_in_r + 8 + h_pad

    kernel = _make_gcn_kernel(f_in, h_pad, f_pad, r_w1, r_b1, r_w2, r_b2)

    vmem = pl.BlockSpec(memory_space=pltpu.MemorySpace.VMEM)
    return pl.pallas_call(
        kernel,
        out_shape=jax.ShapeDtypeStruct((bn, f_pad), jnp.float32),
        in_specs=[vmem, vmem, vmem],
        out_specs=vmem,
    )(x_flat, a_blk, params_packed)


# ---------------------------------------------------------------------------
# JAX glue: graph construction + edge-weight generation (module_testing).
# Scalar/gather-heavy preprocessing on tiny tensors -> plain XLA, fused by jit.
# ---------------------------------------------------------------------------
def generate_graph_edges(num_boxes):
    # complete undirected graph, edges listed once (i < j), like networkx+combinations
    return jnp.array(list(itertools.combinations(range(num_boxes), 2)),
                     dtype=jnp.int32).reshape(-1, 2)


def generate_weight(location_t, edges, mask, past_location_t):
    """location_t: (B, N, 6), edges: (E, 2), mask: (B, N) bool, past: (B, T, N, 6)."""
    e0 = edges[:, 0]
    e1 = edges[:, 1]

    # box centers from location_t  ([id, x1, y1, x2, y2, score])
    cx = 0.5 * (location_t[:, :, 1] + location_t[:, :, 3])            # (B, N)
    cy = 0.5 * (location_t[:, :, 2] + location_t[:, :, 4])
    d = (cx[:, e0] - cx[:, e1]) ** 2 + (cy[:, e0] - cy[:, e1]) ** 2   # (B, E)

    # motion distance from past locations
    cp = past_location_t[..., 3:-1] - past_location_t[..., 1:3]       # (B, T, N, 2)
    cpx = cp[..., 0] * 1280.0                                         # (B, T, N)
    cpy = cp[..., 1] * 720.0
    dx = cpx[:, -1, :] - cpx[:, 0, :]                                 # (B, N)
    dy = cpy[:, -1, :] - cpy[:, 0, :]
    length = jnp.sqrt(dx ** 2 + dy ** 2)
    length = jnp.where(length == 0.0, 1.0, length)
    ndx = dx / length
    ndy = dy / length
    x0 = cpx[:, 0, :]
    y0 = cpy[:, 0, :]
    d1 = jnp.sqrt((x0[:, e0] + ndx[:, e0] - x0[:, e1] - ndx[:, e1]) ** 2
                  + (y0[:, e0] + ndy[:, e0] - y0[:, e1] - ndy[:, e1]) ** 2)
    d2 = jnp.sqrt((x0[:, e0] - x0[:, e1]) ** 2 + (y0[:, e0] - y0[:, e1]) ** 2)
    md = d1 - d2                                                      # (B, E)

    w = jnp.exp(-(0.7 * d + 0.3 * md))
    valid = mask[:, e0] & mask[:, e1]
    w = jnp.where(valid, w, 0.0)

    # min-max per batch element; guard the degenerate all-equal case (the torch
    # reference divides by zero / NaNs there -- intentional small deviation).
    wmin = jnp.min(w, axis=1, keepdims=True)
    wmax = jnp.max(w, axis=1, keepdims=True)
    denom = wmax - wmin
    return jnp.where(denom > 0.0, (w - wmin) / denom, 0.0)


@jax.jit
def spatial_graph_batch_test(params, location_t, feature_t, mask_t, past_location_t):
    """Equivalent of SpatialGraphBatch.forward(param_dict, module='Test')."""
    w1, b1, w2, b2 = params
    B, N, _ = location_t.shape
    f_in = feature_t.shape[-1]
    hidden = w1.shape[1]
    f_out = w2.shape[1]

    edges = generate_graph_edges(N)                                      # (E, 2)
    w_nor = generate_weight(location_t, edges, mask_t, past_location_t)  # (B, E)

    # Dense edge matrix ew[dst, src] for directed edges e0 -> e1 (the reference
    # feeds the single-direction (i<j) edge list as edge_index with
    # flow='source_to_target'; PyG does NOT symmetrize), plus unit self-loops.
    ew = jnp.zeros((B, N, N), jnp.float32)
    ew = ew.at[:, edges[:, 1], edges[:, 0]].set(w_nor)
    ew = ew + jnp.eye(N, dtype=jnp.float32)[None]

    # gcn_norm, computed once inside the fused jit region and reused by both
    # layers in the kernel:
    #   deg[dst] = sum_src ew[dst, src]  (>= 1 thanks to self-loops -> no guard)
    #   A_hat[dst, src] = deg^-1/2[dst] * ew[dst, src] * deg^-1/2[src]
    deg = jnp.sum(ew, axis=2, keepdims=True)                             # (B, N, 1)
    dis = jax.lax.rsqrt(deg)                                             # (B, N, 1)
    a_hat = dis * ew * jnp.swapaxes(dis, 1, 2)                           # (B, N, N)

    # Block-diagonal (B*N, B*N) so the whole batch is one kernel invocation /
    # one MXU tile (no cross-batch mixing: off-diagonal blocks are zero).
    a_blk = (jnp.eye(B, dtype=jnp.float32)[:, None, :, None]
             * a_hat[:, :, None, :]).reshape(B * N, B * N)

    x_flat = feature_t.astype(jnp.float32).reshape(B * N, f_in)          # (B*N, F_in)

    # Pack all parameters into one 128-lane-padded slab:
    #   rows [0, f_in)                       : W1 (F_in, hidden) -> lanes [0, hidden)
    #   rows [f_in_r, f_in_r+1)              : b1
    #   rows [f_in_r+8, f_in_r+8+hidden)     : W2 (hidden, f_out); padded K-rows = 0
    #   rows [f_in_r+8+h_pad, ...+1)         : b2
    h_pad = _round_up(hidden, 128)
    f_pad = _round_up(f_out, 128)
    f_in_r = _round_up(f_in, 8)
    lanes = max(h_pad, f_pad)
    rows = f_in_r + 8 + h_pad + 8
    p = jnp.zeros((rows, lanes), jnp.float32)
    p = p.at[0:f_in, 0:hidden].set(w1.astype(jnp.float32))
    p = p.at[f_in_r:f_in_r + 1, 0:hidden].set(b1.astype(jnp.float32))
    p = p.at[f_in_r + 8:f_in_r + 8 + hidden, 0:f_out].set(w2.astype(jnp.float32))
    p = p.at[f_in_r + 8 + h_pad:f_in_r + 8 + h_pad + 1, 0:f_out].set(
        b2.astype(jnp.float32))

    # TODO(synk): cast x_flat / a_blk / p to bf16 (matmul operands only) on
    #             v6e/v7x once N grows; negligible at B=2, N=8.
    out = two_layer_gcn(x_flat, a_blk, p, f_in, hidden, f_out)           # (B*N, f_pad)
    return out[:, :f_out].reshape(B, N, f_out)


# ---------------------------------------------------------------------------
# Deterministic parameter init (synthetic; shapes from __init__).
# ---------------------------------------------------------------------------
def init_params(key, node_feature, hidden_feature, out_feature):
    k1, k2 = jax.random.split(key)
    lim1 = (6.0 / (node_feature + hidden_feature)) ** 0.5
    lim2 = (6.0 / (hidden_feature + out_feature)) ** 0.5
    w1 = jax.random.uniform(k1, (node_feature, hidden_feature), jnp.float32, -lim1, lim1)
    w2 = jax.random.uniform(k2, (hidden_feature, out_feature), jnp.float32, -lim2, lim2)
    b1 = jnp.zeros((1, hidden_feature), jnp.float32)   # GCNConv bias init = zeros
    b2 = jnp.zeros((1, out_feature), jnp.float32)
    return w1, b1, w2, b2


if __name__ == "__main__":
    B, T, N = 2, 4, 8                # batch, past time steps, boxes (nodes)
    node_feature, hidden_feature, out_feature = 16, 32, 16

    key = jax.random.PRNGKey(0)
    k_loc, k_feat, k_past, k_param = jax.random.split(key, 4)

    location_t = jax.random.uniform(k_loc, (B, N, 6), jnp.float32)        # [id,x1,y1,x2,y2,score]
    feature_t = jax.random.normal(k_feat, (B, N, node_feature), jnp.float32)
    mask_t = jnp.ones((B, N), dtype=bool)
    past_location_t = jax.random.uniform(k_past, (B, T, N, 6), jnp.float32)

    params = init_params(k_param, node_feature, hidden_feature, out_feature)

    out = spatial_graph_batch_test(params, location_t, feature_t, mask_t, past_location_t)
    out = jax.block_until_ready(out)

    assert out.shape == (B, N, out_feature)
    assert bool(jnp.all(jnp.isfinite(out)))
    print("KERNEL_OK")
</pallas_src>

<mosaic_0001>
module attributes {stable_mosaic.version = 11 : i64} {
  func.func @kernel(%arg0: memref<16x16xf32, #tpu.memory_space<vmem>>, %arg1: memref<16x16xf32, #tpu.memory_space<vmem>>, %arg2: memref<160x128xf32, #tpu.memory_space<vmem>>, %arg3: memref<16x128xf32, #tpu.memory_space<vmem>>) attributes {dimension_semantics = [], scalar_prefetch = 0 : i64, scratch_operands = 0 : i64, tpu.core_type = #tpu.core_type<tc>} {
    %c0 = arith.constant 0 : index
    %c0_0 = arith.constant 0 : index
    %0 = vector.load %arg1[%c0, %c0_0] : memref<16x16xf32, #tpu.memory_space<vmem>>, vector<16x16xf32>
    %c0_1 = arith.constant 0 : index
    %c0_2 = arith.constant 0 : index
    %1 = vector.load %arg0[%c0_1, %c0_2] : memref<16x16xf32, #tpu.memory_space<vmem>>, vector<16x16xf32>
    %c0_3 = arith.constant 0 : index
    %c0_4 = arith.constant 0 : index
    %2 = vector.load %arg2[%c0_3, %c0_4] : memref<160x128xf32, #tpu.memory_space<vmem>>, vector<16x128xf32>
    %c16 = arith.constant 16 : index
    %c0_5 = arith.constant 0 : index
    %3 = vector.load %arg2[%c16, %c0_5] : memref<160x128xf32, #tpu.memory_space<vmem>>, vector<1x128xf32>
    %c24 = arith.constant 24 : index
    %c0_6 = arith.constant 0 : index
    %4 = vector.load %arg2[%c24, %c0_6] : memref<160x128xf32, #tpu.memory_space<vmem>>, vector<128x128xf32>
    %c152 = arith.constant 152 : index
    %c0_7 = arith.constant 0 : index
    %5 = vector.load %arg2[%c152, %c0_7] : memref<160x128xf32, #tpu.memory_space<vmem>>, vector<1x128xf32>
    %cst = arith.constant dense<0.000000e+00> : vector<16x16xf32>
    %6 = tpu.matmul %0, %1, %cst {dimension_numbers = #tpu.dot_dimension_numbers<[1], [0], [0], [1], [0, 0, 1, 1], [], []>} : vector<16x16xf32>, vector<16x16xf32>, vector<16x16xf32> -> vector<16x16xf32>
    %cst_8 = arith.constant dense<0.000000e+00> : vector<16x128xf32>
    %7 = tpu.matmul %6, %2, %cst_8 {dimension_numbers = #tpu.dot_dimension_numbers<[1], [0], [0], [1], [0, 0, 1, 1], [], []>} : vector<16x16xf32>, vector<16x128xf32>, vector<16x128xf32> -> vector<16x128xf32>
    %8 = vector.broadcast %3 : vector<1x128xf32> to vector<16x128xf32>
    %9 = arith.addf %7, %8 : vector<16x128xf32>
    %10 = arith.negf %9 : vector<16x128xf32>
    %11 = math.exp %10 : vector<16x128xf32>
    %cst_9 = arith.constant 1.000000e+00 : f32
    %12 = vector.broadcast %cst_9 : f32 to vector<16x128xf32>
    %13 = arith.addf %12, %11 : vector<16x128xf32>
    %14 = arith.divf %12, %13 : vector<16x128xf32>
    %cst_10 = arith.constant dense<0.000000e+00> : vector<16x128xf32>
    %15 = tpu.matmul %0, %14, %cst_10 {dimension_numbers = #tpu.dot_dimension_numbers<[1], [0], [0], [1], [0, 0, 1, 1], [], []>} : vector<16x16xf32>, vector<16x128xf32>, vector<16x128xf32> -> vector<16x128xf32>
    %cst_11 = arith.constant dense<0.000000e+00> : vector<16x128xf32>
    %16 = tpu.matmul %15, %4, %cst_11 {dimension_numbers = #tpu.dot_dimension_numbers<[1], [0], [0], [1], [0, 0, 1, 1], [], []>} : vector<16x128xf32>, vector<128x128xf32>, vector<16x128xf32> -> vector<16x128xf32>
    %17 = vector.broadcast %5 : vector<1x128xf32> to vector<16x128xf32>
    %18 = arith.addf %16, %17 : vector<16x128xf32>
    %19 = arith.negf %18 : vector<16x128xf32>
    %20 = math.exp %19 : vector<16x128xf32>
    %cst_12 = arith.constant 1.000000e+00 : f32
    %21 = vector.broadcast %cst_12 : f32 to vector<16x128xf32>
    %22 = arith.addf %21, %20 : vector<16x128xf32>
    %23 = arith.divf %21, %22 : vector<16x128xf32>
    %c0_13 = arith.constant 0 : index
    %c0_14 = arith.constant 0 : index
    %24 = vector.load %arg3[%c0_13, %c0_14] : memref<16x128xf32, #tpu.memory_space<vmem>>, vector<16x128xf32>
    tpu.vector_store %arg3[%c0_13, %c0_14], %23 {strides = array<i32>} : memref<16x128xf32, #tpu.memory_space<vmem>>, vector<16x128xf32>,
    return
  }
}

</mosaic_0001>

<bundles_post_ra>
// kernel: spatial_graph_batch_test.1
= control target key start
LH: loop header
LB: loop body
LE: loop exit
PB: predicated region body
PF: predicated region fallthrough
CT: control target
= control target key end

     0   :  { %vm38_vm0 = vcmask 130048   ;;  %s396_s0 = inlined_call_operand.vmem [shape: f32[16,16], index: 0, kind: input, shape index: {}]   ;;  %s397_s1 = inlined_call_operand.vmem [shape: f32[16,16], index: 1, kind: input, shape index: {}]   ;;  %s398_s2 = inlined_call_operand.vmem [shape: f32[160,128], index: 2, kind: input, shape index: {}]   ;;  %s399_s3 = inlined_call_operand.vmem [shape: f32[16,128], index: 3, kind: output, shape index: {}]  }
   0x1   :  { %v17_v0 = vld [vmem:[%s396_s0 + $0x8] sm:$0xff]  ;;  %v16_v1 = vld [vmem:[%s396_s0] sm:$0xff]  ;;  %v253_v8 = vld [vmem:[%s398_s2 + $0x10] ss:$0 sm:$0xff] }
   0x2   :  { %59 = vmatpush.msra.mxu1 %v17_v0  ;;  %v300_v2 = vld [vmem:[%s397_s1] sm:$0xff]  ;;  %v19_v3 = vld [vmem:[%s398_s2 + $0x8] sm:$0xff]  ;;  %v36_v17 = vld [vmem:[%s398_s2 + $0x90] sm:$0xff] }
   0x3   :  { %v18_v4 = vld [vmem:[%s398_s2] sm:$0xff]  ;;  %v313_v5 = vld [vmem:[%s397_s1 + $0x8] sm:$0xff]  ;;  %160 = vmatpush.msra.mxu0 %v36_v17  ;;  %237 = vmatpush.msra.mxu3 %v36_v17  ;;  %v33_v24 = vld [vmem:[%s398_s2 + $0x78] sm:$0xff] }
   0x4   :  { %60 = vmatpush.msra.mxu1 %v16_v1  ;;  %v35_v18 = vld [vmem:[%s398_s2 + $0x88] sm:$0xff]  ;;  %v34_v22 = vld [vmem:[%s398_s2 + $0x80] sm:$0xff]  ;;  %v32_v25 = vld [vmem:[%s398_s2 + $0x70] sm:$0xff] }
   0x5   :  { %227 = vmatmul.msk.f32.vlgmr.msra.gmra.mxu1 %vm38_vm0, %v300_v2  ;;  %161 = vmatpush.msra.mxu0 %v35_v18  ;;  %v31_v27 = vld [vmem:[%s398_s2 + $0x68] sm:$0xff]  ;;  %v30_v29 = vld [vmem:[%s398_s2 + $0x60] sm:$0xff]  ;;  %v29_v32 = vld [vmem:[%s398_s2 + $0x58] sm:$0xff] }
   0x6   :  { %89 = vmatpush.msrb.mxu1 %v19_v3  ;;  %238 = vmatpush.msra.mxu3 %v35_v18  ;;  %v28_v35 = vld [vmem:[%s398_s2 + $0x50] sm:$0xff]  ;;  %v27_v40 = vld [vmem:[%s398_s2 + $0x48] sm:$0xff]  ;;  %v26_v45 = vld [vmem:[%s398_s2 + $0x40] sm:$0xff] }
   0x7   :  { %162 = vmatpush.msra.mxu0 %v34_v22  ;;  %v25_v50 = vld [vmem:[%s398_s2 + $0x38] sm:$0xff]  ;;  %v24_v52 = vld [vmem:[%s398_s2 + $0x30] sm:$0xff]  ;;  %v23_v53 = vld [vmem:[%s398_s2 + $0x28] sm:$0xff] }
   0x8   :  { %90 = vmatpush.msrb.mxu1 %v18_v4  ;;  %239 = vmatpush.msra.mxu3 %v34_v22  ;;  %v22_v54 = vld [vmem:[%s398_s2 + $0x20] sm:$0xff]  ;;  %v21_v55 = vld [vmem:[%s398_s2 + $0x18] sm:$0xff] }
   0x9   :  { %163 = vmatpush.msra.mxu0 %v33_v24  ;;  %v254_v58 = vld [vmem:[%s398_s2 + $0x98] ss:$0 sm:$0xff] }
   0xa   :  { %240 = vmatpush.msra.mxu3 %v33_v24 }
   0xb   :  { %164 = vmatpush.msra.mxu0 %v32_v25 }
   0xc   :  { %241 = vmatpush.msra.mxu3 %v32_v25 }
   0xd   :  { %228 = vmatmul.msk.f32.gmra.mxu1 %vm38_vm0, %v313_v5  ;;  %165 = vmatpush.msra.mxu0 %v31_v27 }
   0xe   :  { %242 = vmatpush.msra.mxu3 %v31_v27 }
   0xf   :  { %166 = vmatpush.msra.mxu0 %v30_v29 }
  0x10   :  { %243 = vmatpush.msra.mxu3 %v30_v29 }
  0x11   :  { %167 = vmatpush.msra.mxu0 %v29_v32 }
  0x12   :  { %244 = vmatpush.msra.mxu3 %v29_v32 }
  0x13   :  { %168 = vmatpush.msra.mxu0 %v28_v35 }
  0x14   :  { %245 = vmatpush.msra.mxu3 %v28_v35 }
  0x15   :  { %169 = vmatpush.msra.mxu0 %v27_v40 }
  0x16   :  { %246 = vmatpush.msra.mxu3 %v27_v40 }
  0x17   :  { %170 = vmatpush.msra.mxu0 %v26_v45 }
  0x18   :  { %247 = vmatpush.msra.mxu3 %v26_v45 }
  0x19   :  { %171 = vmatpush.msra.mxu0 %v25_v50 }
  0x1a   :  { %248 = vmatpush.msra.mxu3 %v25_v50 }
  0x1b   :  { %172 = vmatpush.msra.mxu0 %v24_v52 }
  0x1c   :  { %249 = vmatpush.msra.mxu3 %v24_v52 }
  0x1d   :  { %173 = vmatpush.msra.mxu0 %v23_v53 }
  0x1e   :  { %250 = vmatpush.msra.mxu3 %v23_v53 }
  0x1f   :  { %174 = vmatpush.msra.mxu0 %v22_v54 }
  0x20   :  { %251 = vmatpush.msra.mxu3 %v22_v54 }
  0x21   :  { %175 = vmatpush.msra.mxu0 %v21_v55 }
  0x22   :  { %252 = vmatpush.msra.mxu3 %v21_v55 }
  0x82   :  { %v62_v6 = vpop.f32.mrf.mxu1 }
  0x83   :  { %229 = vmatmul.msk.f32.vlgmr.msrb.gmra.mxu1 %vm38_vm0, %v62_v6 }
  0x8a   :  { %v65_v7 = vpop.f32.mrf.mxu1 }
  0x8b   :  { %230 = vmatmul.msk.f32.gmra.mxu1 %vm38_vm0, %v65_v7 }
 0x100   :  { %v92_v9 = vpop.f32.mrf.mxu1 }
 0x101   :  { %v93_v10 = vadd.f32 %v253_v8, %v92_v9 }
 0x103   :  { %v231_v11 = vmul.f32 -1.442695, %v93_v10 }
 0x105   :  { %255 = vpow2.f32 %v231_v11 }
 0x108   :  { %v95_v12 = vpop.f32.mrf.mxu1 }
 0x109   :  { %v96_v13 = vadd.f32 %v253_v8, %v95_v12 }
 0x10b   :  { %v256_v14 = vpop.eup %255  ;;  %v232_v15 = vmul.f32 -1.442695, %v96_v13 }
 0x10c   :  { %v322_v16 = vadd.f32 1.0, %v256_v14 }
 0x10d   :  { %257 = vpow2.f32 %v232_v15 }
 0x10e   :  { %259 = vrcp.f32 %v322_v16  ;;  %vm111_vm3 = vweird.f32 %v322_v16  ;;  %v117_v39 = vand.u32 2147483648, %v322_v16  ;;  %v115_v43 = vand.u32 2147483647, %v322_v16 }
 0x110   :  { %v118_v49 = vor.u32 1.1754944e-38, %v117_v39  ;;  %vm116_vm8 = vcmp.eq.f32.partialorder %v115_v43, 8.507059e+37 }
 0x113   :  { %v258_v19 = vpop.eup %257 }
 0x114   :  { %v260_v20 = vpop.eup %259  ;;  %v105_v21 = vadd.f32 1.0, %v258_v19 }
 0x115   :  { %v107_v23 = vmul.f32 %v260_v20, %v322_v16  ;;  %vm112_vm1 = vweird.f32 %v260_v20 }
 0x116   :  { %261 = vrcp.f32 %v105_v21  ;;  %v132_v34 = vand.u32 2147483648, %v105_v21  ;;  %v130_v37 = vand.u32 2147483647, %v105_v21  ;;  %vm126_vm4 = vweird.f32 %v105_v21  ;;  %vm358_vm5 = vmor %vm111_vm3, %vm112_vm1 }
 0x117   :  { %v108_v26 = vsub.f32 1.0, %v107_v23 }
 0x118   :  { %v133_v44 = vor.u32 1.1754944e-38, %v132_v34  ;;  %vm131_vm7 = vcmp.eq.f32.partialorder %v130_v37, 8.507059e+37 }
 0x119   :  { %v109_v31 = vmul.f32 %v260_v20, %v108_v26 }
 0x11b   :  { %v110_v38 = vadd.f32 %v260_v20, %v109_v31 }
 0x11c   :  { %v262_v28 = vpop.eup %261 }
 0x11d   :  { %v122_v30 = vmul.f32 %v262_v28, %v105_v21  ;;  %vm127_vm2 = vweird.f32 %v262_v28  ;;  %v114_v47 = vsel %vm358_vm5, %v260_v20, %v110_v38 }
 0x11e   :  { %vm128_vm6 = vmor %vm126_vm4, %vm127_vm2  ;;  %v119_v51 = vsel %vm116_vm8, %v118_v49, %v114_v47 }
 0x11f   :  { %v123_v33 = vsub.f32 1.0, %v122_v30 }
 0x121   :  { %v124_v36 = vmul.f32 %v262_v28, %v123_v33 }
 0x123   :  { %v125_v41 = vadd.f32 %v262_v28, %v124_v36 }
 0x125   :  { %v129_v46 = vsel %vm128_vm6, %v262_v28, %v125_v41 }
 0x126   :  { %v134_v48 = vsel %vm131_vm7, %v133_v44, %v129_v46 }
 0x127   :  { %150 = vmatpush.msra.mxu2 %v134_v48 }
 0x129   :  { %151 = vmatpush.msra.mxu2 %v119_v51 }
 0x12a   :  { %233 = vmatmul.msk.f32.vlgmr.msra.gmra.mxu2 %vm38_vm0, %v300_v2 }
 0x132   :  { %234 = vmatmul.msk.f32.gmra.mxu2 %vm38_vm0, %v313_v5 }
 0x1ad   :  { %v153_v56 = vpop.f32.mrf.mxu2 }
 0x1ae   :  { %176 = vmatmul.f32.vlgmr.msra.gmra.mxu0 %v153_v56 }
 0x1b5   :  { %v156_v57 = vpop.f32.mrf.mxu2 }
 0x1b6   :  { %179 = vmatmul.f32.vlgmr.msra.gmra.mxu3 %v156_v57 }
 0x22b   :  { %v177_v59 = vpop.f32.mrf.mxu0 }
 0x22c   :  { %v178_v60 = vadd.f32 %v254_v58, %v177_v59 }
 0x22e   :  { %v235_v61 = vmul.f32 -1.442695, %v178_v60 }
 0x230   :  { %263 = vpow2.f32 %v235_v61 }
 0x236   :  { %v264_v62 = vpop.eup %263 }
 0x237   :  { %v189_v63 = vadd.f32 1.0, %v264_v62 }
 0x239   :  { %265 = vrcp.f32 %v189_v63  ;;  %v180_v0 = vpop.f32.mrf.mxu3  ;;  %v202_v6 = vand.u32 2147483648, %v189_v63  ;;  %v200_v9 = vand.u32 2147483647, %v189_v63  ;;  %vm196_vm10 = vweird.f32 %v189_v63 }
 0x23a   :  { %v181_v1 = vadd.f32 %v254_v58, %v180_v0 }
 0x23b   :  { %v203_v12 = vor.u32 1.1754944e-38, %v202_v6  ;;  %vm201_vm12 = vcmp.eq.f32.partialorder %v200_v9, 8.507059e+37 }
 0x23c   :  { %v236_v2 = vmul.f32 -1.442695, %v181_v1 }
 0x23e   :  { %267 = vpow2.f32 %v236_v2 }
 0x23f   :  { %v266_v3 = vpop.eup %265 }
 0x240   :  { %v192_v4 = vmul.f32 %v266_v3, %v189_v63  ;;  %vm197_vm9 = vweird.f32 %v266_v3 }
 0x241   :  { %vm198_vm11 = vmor %vm196_vm10, %vm197_vm9 }
 0x242   :  { %v193_v5 = vsub.f32 1.0, %v192_v4 }
 0x244   :  { %v268_v7 = vpop.eup %267  ;;  %v194_v8 = vmul.f32 %v266_v3, %v193_v5 }
 0x245   :  { %v190_v10 = vadd.f32 1.0, %v268_v7 }
 0x246   :  { %v195_v11 = vadd.f32 %v266_v3, %v194_v8 }
 0x247   :  { %269 = vrcp.f32 %v190_v10  ;;  %v217_v18 = vand.u32 2147483648, %v190_v10  ;;  %v215_v20 = vand.u32 2147483647, %v190_v10  ;;  %vm211_vm14 = vweird.f32 %v190_v10 }
 0x248   :  { %v199_v13 = vsel %vm198_vm11, %v266_v3, %v195_v11 }
 0x249   :  { %v204_v14 = vsel %vm201_vm12, %v203_v12, %v199_v13  ;;  %v218_v22 = vor.u32 1.1754944e-38, %v217_v18  ;;  %vm216_vm0 = vcmp.eq.f32.partialorder %v215_v20, 8.507059e+37 }
 0x24a   :  { %221 = vst [vmem:[%s399_s3] sm:$0xff] %v204_v14 }
 0x24d   :  { %v270_v15 = vpop.eup %269 }
 0x24e   :  { %v207_v16 = vmul.f32 %v270_v15, %v190_v10  ;;  %vm212_vm13 = vweird.f32 %v270_v15 }
 0x24f   :  { %vm213_vm15 = vmor %vm211_vm14, %vm212_vm13 }
 0x250   :  { %v208_v17 = vsub.f32 1.0, %v207_v16 }
 0x252   :  { %v209_v19 = vmul.f32 %v270_v15, %v208_v17 }
 0x254   :  { %v210_v21 = vadd.f32 %v270_v15, %v209_v19 }
 0x256   :  { %v214_v23 = vsel %vm213_vm15, %v270_v15, %v210_v21 }
 0x257   :  { %v219_v24 = vsel %vm216_vm0, %v218_v22, %v214_v23 }
 0x258   :  { %222 = vst [vmem:[%s399_s3 + $0x8] sm:$0xff] %v219_v24 }

</bundles_post_ra>
